<compile_context>
chip_gen: v7x
topology: tpu7x:2x2x1
jax: 0.10.0
libtpu: 0.0.40
codegen_flags: <defaults>
</compile_context>

<pallas_src>
import functools

import jax
import jax.numpy as jnp
from jax.experimental import pallas as pl
from jax.experimental.pallas import tpu as pltpu


def _round_up(x, m):
    return (x + m - 1) // m * m


def _pad_features(d_out):
    # Small feature widths: pad only to 64 (halves wasted HBM traffic vs 128
    # for D=32); keep lane-dense 128-multiples once d_out >= 128.
    if d_out >= 128:
        return _round_up(d_out, 128)
    return _round_up(d_out, 64)


# ---------------------------------------------------------------------------
# Init-time table fusion (hoisted out of the forward pass).
# ---------------------------------------------------------------------------
def fuse_item_embedding_tables(k_difficulty_table, e_discrimination_table):
    """Fuse k_difficulty [V, D] and e_discrimination [V, 1] into one padded
    [rows_pad, d_pad] table. Done ONCE at parameter-init time."""
    num_items, emb_dim = k_difficulty_table.shape
    d_out = emb_dim + 1
    d_pad = _pad_features(d_out)
    rows_pad = _round_up(num_items, 8)

    fused = jnp.zeros((rows_pad, d_pad), k_difficulty_table.dtype)
    fused = fused.at[:num_items, :emb_dim].set(k_difficulty_table)
    fused = fused.at[:num_items, emb_dim].set(
        e_discrimination_table[:, 0].astype(k_difficulty_table.dtype))
    return fused


# ---------------------------------------------------------------------------
# Kernels.
# ---------------------------------------------------------------------------
def _onehot_lookup_kernel(idx_ref, tbl_ref, out_ref):
    """VMEM-resident table fast path: one-hot [tile_n, rows] @ table on MXU.

    idx_ref : (tile_n, 1) int32 block (VMEM)
    tbl_ref : (rows_pad, d_pad) fused table, constant index_map -> resident
    out_ref : (tile_n, d_pad) output block
    """
    idx = idx_ref[...]                                       # (tile_n, 1)
    tile_n = idx.shape[0]
    rows = tbl_ref.shape[0]
    one_hot = (idx == jax.lax.broadcasted_iota(jnp.int32, (tile_n, rows), 1)
               ).astype(tbl_ref.dtype)
    # HIGHEST precision so the f32 gather-by-matmul is (bit-)exact.
    out_ref[...] = jnp.dot(one_hot, tbl_ref[...],
                           preferred_element_type=jnp.float32,
                           precision=jax.lax.Precision.HIGHEST
                           ).astype(out_ref.dtype)


def _hbm_gather_kernel(idx_ref, tbl_hbm_ref, out_ref, sem, *, tile_n, window):
    """Large-table fallback: per-row HBM DMA gather with a rolling semaphore
    window (bounded in-flight DMAs, no tile_n-way static unroll).

    idx_ref     : [n_pad] int32 in SMEM (scalar prefetch)
    tbl_hbm_ref : [rows_pad, d_pad] fused table left in HBM (pl.ANY)
    out_ref     : [tile_n, d_pad] VMEM output block for this grid step
    sem         : [window] DMA semaphores
    """
    base = pl.program_id(0) * tile_n

    def start_row(r):
        row = idx_ref[base + r]                     # scalar read from SMEM
        pltpu.make_async_copy(
            tbl_hbm_ref.at[pl.ds(row, 1), :],       # one table row in HBM
            out_ref.at[pl.ds(r, 1), :],             # row r of output block
            sem.at[r % window],
        ).start()

    # Prime the in-flight window (all SMEM index reads before any .wait()).
    for r in range(window):                          # static, window <= 16
        start_row(r)

    def body(r, carry):
        # Wait for row r (same shape/bytes as the issued copy), then reuse
        # its semaphore slot to launch row r + window.
        pltpu.make_async_copy(
            tbl_hbm_ref.at[pl.ds(0, 1), :],
            out_ref.at[pl.ds(r, 1), :],
            sem.at[r % window],
        ).wait()

        @pl.when(r + window < tile_n)
        def _():
            start_row(r + window)

        return carry

    jax.lax.fori_loop(0, tile_n, body, 0)


# ---------------------------------------------------------------------------
# Forward wrapper.
# ---------------------------------------------------------------------------
def item_embedding_forward(item_inputs, fused_table, num_items, embedding_dim,
                           *, tile_n=256, force_hbm_gather=False,
                           dma_window=8, vmem_table_budget_bytes=16 << 20,
                           onehot_max_rows=4096):
    """Reproduces ItemEmbeddingLayer.forward.

    item_inputs : int32 [B, S]
    fused_table : output of fuse_item_embedding_tables (init-time constant)
    returns (k_diff [B, S, D], e_disc [B, S, 1])
    """
    B, S = item_inputs.shape
    N = B * S
    rows_pad, d_pad = fused_table.shape
    d_out = embedding_dim + 1

    # Clamp so an out-of-range id can never become an unchecked OOB HBM DMA.
    # Note: nn.Embedding would raise instead; here bad ids silently map to a
    # valid row.
    idx = jnp.clip(item_inputs.reshape(N).astype(jnp.int32), 0, num_items - 1)

    tile_n = max(8, min(tile_n, _round_up(N, 8)))
    n_pad = _round_up(N, tile_n)
    if n_pad != N:
        idx = jnp.pad(idx, (0, n_pad - N))   # padded rows gather row 0, dropped below
    grid = (n_pad // tile_n,)

    table_bytes = rows_pad * d_pad * fused_table.dtype.itemsize
    use_onehot = (not force_hbm_gather
                  and rows_pad <= onehot_max_rows
                  and table_bytes <= vmem_table_budget_bytes)

    if use_onehot:
        # VMEM-resident table (constant index_map -> fetched once, stays
        # resident across the whole grid) + one-hot MXU lookup.
        out = pl.pallas_call(
            _onehot_lookup_kernel,
            out_shape=jax.ShapeDtypeStruct((n_pad, d_pad), fused_table.dtype),
            grid=grid,
            in_specs=[
                pl.BlockSpec((tile_n, 1), lambda i: (i, 0)),
                pl.BlockSpec((rows_pad, d_pad), lambda i: (0, 0)),
            ],
            out_specs=pl.BlockSpec((tile_n, d_pad), lambda i: (i, 0)),
            compiler_params=pltpu.CompilerParams(
                dimension_semantics=("parallel",)),
        )(idx.reshape(n_pad, 1), fused_table)
    else:
        # TODO(synk): add a middle path (VMEM-resident table + in-kernel
        # dynamic-slice gather) for tables that fit VMEM but have too many
        # rows for the one-hot matmul.
        window = max(1, min(dma_window, tile_n))
        kernel = functools.partial(_hbm_gather_kernel,
                                   tile_n=tile_n, window=window)
        out = pl.pallas_call(
            kernel,
            out_shape=jax.ShapeDtypeStruct((n_pad, d_pad), fused_table.dtype),
            grid_spec=pltpu.PrefetchScalarGridSpec(
                num_scalar_prefetch=1,
                grid=grid,
                in_specs=[pl.BlockSpec(memory_space=pl.ANY)],  # table in HBM
                out_specs=pl.BlockSpec((tile_n, d_pad),
                                       lambda i, idx_ref: (i, 0)),
                scratch_shapes=[pltpu.SemaphoreType.DMA((window,))],
            ),
            compiler_params=pltpu.CompilerParams(
                dimension_semantics=("parallel",)),
        )(idx, fused_table)

    out = out[:N]
    k_diff = out[:, :embedding_dim].reshape(B, S, embedding_dim)
    e_disc = out[:, embedding_dim:d_out].reshape(B, S, 1)
    return k_diff, e_disc


if __name__ == "__main__":
    # Small, deterministic setup consistent with the module's __init__.
    num_items = 64
    embedding_dim = 32
    batch, seq = 2, 8

    key = jax.random.PRNGKey(0)
    k_tbl_key, e_tbl_key, idx_key = jax.random.split(key, 3)

    # nn.Embedding default init is N(0, 1).
    k_difficulty_table = jax.random.normal(
        k_tbl_key, (num_items, embedding_dim), dtype=jnp.float32)
    e_discrimination_table = jax.random.normal(
        e_tbl_key, (num_items, 1), dtype=jnp.float32)

    item_inputs = jax.random.randint(
        idx_key, (batch, seq), minval=0, maxval=num_items, dtype=jnp.int32)

    # Init-time (hoisted) table fusion -- not part of the per-step forward.
    fused_table = fuse_item_embedding_tables(k_difficulty_table,
                                             e_discrimination_table)
    jax.block_until_ready(fused_table)

    # Pure-JAX reference (plain gathers).
    k_ref = jnp.take(k_difficulty_table, item_inputs, axis=0)
    e_ref = jnp.take(e_discrimination_table, item_inputs, axis=0)

    # Fast path: VMEM-resident table + one-hot MXU lookup.
    k_diff, e_disc = item_embedding_forward(
        item_inputs, fused_table, num_items, embedding_dim)
    jax.block_until_ready((k_diff, e_disc))
    assert k_diff.shape == (batch, seq, embedding_dim)
    assert e_disc.shape == (batch, seq, 1)
    assert jnp.allclose(k_diff, k_ref, rtol=1e-5, atol=1e-5)
    assert jnp.allclose(e_disc, e_ref, rtol=1e-5, atol=1e-5)

    # Large-table fallback: HBM DMA gather with a rolling semaphore window.
    k_diff2, e_disc2 = item_embedding_forward(
        item_inputs, fused_table, num_items, embedding_dim,
        force_hbm_gather=True)
    jax.block_until_ready((k_diff2, e_disc2))
    assert jnp.allclose(k_diff2, k_ref, rtol=1e-5, atol=1e-5)
    assert jnp.allclose(e_disc2, e_ref, rtol=1e-5, atol=1e-5)

    print("KERNEL_OK")
</pallas_src>

<mosaic_0001>
module attributes {stable_mosaic.version = 11 : i64} {
  func.func @_onehot_lookup_kernel(%arg0: i32, %arg1: memref<16x1xi32, #tpu.memory_space<vmem>>, %arg2: memref<64x64xf32, #tpu.memory_space<vmem>>, %arg3: memref<16x64xf32, #tpu.memory_space<vmem>>) attributes {dimension_semantics = [#tpu.dimension_semantics<parallel>], iteration_bounds = array<i64: 1>, scalar_prefetch = 0 : i64, scratch_operands = 0 : i64, tpu.core_type = #tpu.core_type<tc>, window_params = [{transform_indices = @transform_0, window_bounds = array<i64: 16, 1>}, {pipeline_mode = #tpu.pipeline_mode<synchronous>, transform_indices = @transform_1, window_bounds = array<i64: 64, 64>}, {transform_indices = @transform_2, window_bounds = array<i64: 16, 64>}]} {
    %c0 = arith.constant 0 : index
    %c0_0 = arith.constant 0 : index
    %0 = vector.load %arg1[%c0, %c0_0] : memref<16x1xi32, #tpu.memory_space<vmem>>, vector<16x1xi32>
    %1 = tpu.iota {dimensions = array<i32: 1>} : vector<16x64xi32>
    %2 = vector.broadcast %0 : vector<16x1xi32> to vector<16x64xi32>
    %3 = arith.cmpi eq, %2, %1 : vector<16x64xi32>
    %4 = arith.extui %3 : vector<16x64xi1> to vector<16x64xi32>
    %5 = arith.sitofp %4 : vector<16x64xi32> to vector<16x64xf32>
    %c0_1 = arith.constant 0 : index
    %c0_2 = arith.constant 0 : index
    %6 = vector.load %arg2[%c0_1, %c0_2] : memref<64x64xf32, #tpu.memory_space<vmem>>, vector<64x64xf32>
    %cst = arith.constant dense<0.000000e+00> : vector<16x64xf32>
    %7 = tpu.matmul %5, %6, %cst {dimension_numbers = #tpu.dot_dimension_numbers<[1], [0], [0], [1], [0, 0, 1, 1], [], []>, precision = #tpu.contract_precision<fp32>} : vector<16x64xf32>, vector<64x64xf32>, vector<16x64xf32> -> vector<16x64xf32>
    %c0_3 = arith.constant 0 : index
    %c0_4 = arith.constant 0 : index
    %8 = vector.load %arg3[%c0_3, %c0_4] : memref<16x64xf32, #tpu.memory_space<vmem>>, vector<16x64xf32>
    tpu.vector_store %arg3[%c0_3, %c0_4], %7 {strides = array<i32>} : memref<16x64xf32, #tpu.memory_space<vmem>>, vector<16x64xf32>,
    return
  }
  func.func @transform_0(%arg0: i32) -> (i32, i32) {
    %c0_i32 = arith.constant 0 : i32
    %c0_i32_0 = arith.constant 0 : i32
    return %arg0, %c0_i32 : i32, i32
  }
  func.func @transform_1(%arg0: i32) -> (i32, i32) {
    %c0_i32 = arith.constant 0 : i32
    %c0_i32_0 = arith.constant 0 : i32
    %c0_i32_1 = arith.constant 0 : i32
    return %c0_i32, %c0_i32_0 : i32, i32
  }
  func.func @transform_2(%arg0: i32) -> (i32, i32) {
    %c0_i32 = arith.constant 0 : i32
    %c0_i32_0 = arith.constant 0 : i32
    return %arg0, %c0_i32 : i32, i32
  }
}

</mosaic_0001>

<bundles_post_ra>
// kernel: tpu_custom_call.1
= control target key start
LH: loop header
LB: loop body
LE: loop exit
PB: predicated region body
PF: predicated region fallthrough
CT: control target
= control target key end

     0   :  { %7 = vsyncpa [#allocation3], 0  ;;  %s1102_s0 = inlined_call_operand.vmem [shape: s32[16,1], index: 0, kind: input, shape index: {}]   ;;  %s1103_s1 = inlined_call_operand.hbm [shape: f32[64,64], index: 1, kind: input, shape index: {}]   ;;  %s1104_s2 = inlined_call_operand.hbm [shape: f32[16,64], index: 2, kind: output, shape index: {}]  }
   0x1   :  { %8 = vsyncpa [#allocation4], 0  ;;  %s999_s9 = smov [#allocation2]   ;;  %s951_s13 = scalar_lea.hbm %s1103_s1, 1024 }
   0x2   :  { %s16_s10 = sshll.u32 %s999_s9, 4  ;;  %p952_p0 = scmp.ne.s32.totalorder %s1103_s1, %s951_s13  ;;  %s17_s10 = int_to_ptr.vmem [resolvable:$true] %s16_s10 }
   0x3   :  { %p955_p1 = scmp.lt.u32.totalorder %s951_s13, %s1103_s1 }
   0x5   :  { %p957_p2 = pnand %p955_p1, %p952_p0 }
   0x7   :  { %960 = shalt.err (!%p957_p2)
}
   0x8   :  { %s961_s18 = scalar_lea.vmem %s17_s10, 1024  ;;  %p966_p4 = scmp.lt.s32.totalorder %s17_s10, %s17_s10 }
   0x9   :  { %p962_p3 = scmp.ne.s32.totalorder %s17_s10, %s961_s18  ;;  %p967_p5 = scmp.lt.s32.totalorder %s961_s18, %s961_s18 }
   0xb   :  { %p968_p6 = por %p967_p5, %p966_p4 }
   0xd   :  { %p969_p7 = pnand %p968_p6, %p962_p3 }
   0xf   :  { %972 = shalt.err (!%p969_p7)
}
  0x10   :  { %s1000_s19 = smov 128   ;;  %s1001_s20 = smov 8  }
  0x11   :  { %22 = dma.hbm_to_vmem [thread:$0]  %s1103_s1, 1024, %s17_s10, [#allocation3], %s1000_s19, %s1000_s19, %s1001_s20  }
  0x12   :  { %995 = dma.done.wait [#allocation3], 1024  }
  0x13   :  { %996 = vsyncadd [#allocation3], 4294966272  ;;  %v1002_v0 = vmov 0   ;;  %v26_v1 = vld [vmem:[%s1102_s0] sm:$0xff]  ;;  %v43_v3 = vld [vmem:[#allocation2 + $0x8] sm:$0xff]  ;;  %vm50_vm0 = vcmask 523264  }
  0x14   :  { %950 = vset.pattern.permute.xlu0 %v1002_v0  ;;  %v42_v2 = vld [vmem:[#allocation2] sm:$0xff]  ;;  %v44_v5 = vld [vmem:[#allocation2 + $0x10] sm:$0xff]  ;;  %v45_v6 = vld [vmem:[#allocation2 + $0x18] sm:$0xff]  ;;  %v61_v8 = vand.u32 4294901760, %v43_v3 }
  0x15   :  { %31 = vperm.xlu0 %950, %v26_v1   ;;  %v58_v4 = vand.u32 4294901760, %v42_v2  ;;  %v27_v7 = vld [vmem:[%s1102_s0 + $0x8] sm:$0xff]  ;;  %v64_v9 = vand.u32 4294901760, %v44_v5  ;;  %v67_v10 = vand.u32 4294901760, %v45_v6  ;;  %v46_v11 = vld [vmem:[#allocation2 + $0x20] sm:$0xff]  ;;  %v48_v17 = vld [vmem:[#allocation2 + $0x30] sm:$0xff] }
  0x16   :  { %v47_v12 = vld [vmem:[#allocation2 + $0x28] sm:$0xff]  ;;  %v70_v15 = vand.u32 4294901760, %v46_v11  ;;  %v49_v18 = vld [vmem:[#allocation2 + $0x38] sm:$0xff]  ;;  %v159_v20 = vsub.f32 %v43_v3, %v61_v8  ;;  %v76_v21 = vand.u32 4294901760, %v48_v17  ;;  %v28_v3 = vlaneseq  ;;  %s1004_s0 = smov [#allocation5]  }
  0x17   :  { %v1041_v13 = vpack.c.bf16 %v61_v8, %v58_v4  ;;  %v1043_v14 = vpack.c.bf16 %v67_v10, %v64_v9  ;;  %v73_v16 = vand.u32 4294901760, %v47_v12  ;;  %v152_v19 = vsub.f32 %v42_v2, %v58_v4  ;;  %s644_s1 = sshll.u32 %s1004_s0, 4  ;;  %s645_s1 = int_to_ptr.vmem [resolvable:$true] %s644_s1 }
  0x18   :  { %v79_v22 = vand.u32 4294901760, %v49_v18  ;;  %v160_v24 = vand.u32 4294901760, %v159_v20  ;;  %v166_v28 = vsub.f32 %v44_v5, %v64_v9  ;;  %v173_v29 = vsub.f32 %v45_v6, %v67_v10  ;;  %s973_s27 = scalar_lea.vmem %s645_s1, 256  ;;  %p978_p9 = scmp.lt.s32.totalorder %s645_s1, %s645_s1 }
  0x19   :  { %34 = vperm.xlu0 %950, %v27_v7   ;;  %887 = vmatprep.subr.bf16.mxu0 %v1041_v13  ;;  %v153_v23 = vand.u32 4294901760, %v152_v19  ;;  %v1051_v25 = vpack.c.bf16 %v73_v16, %v70_v15  ;;  %v180_v38 = vsub.f32 %v46_v11, %v70_v15  ;;  %v187_v39 = vsub.f32 %v47_v12, %v73_v16  ;;  %p974_p8 = scmp.ne.s32.totalorder %s645_s1, %s973_s27  ;;  %p979_p10 = scmp.lt.s32.totalorder %s973_s27, %s973_s27 }
  0x1a   :  { %839 = vmatprep.subr.bf16.mxu1 %v1041_v13  ;;  %889 = vmatpush3.bf16.msra.mxu0 %v1041_v13  ;;  %v161_v27 = vsub.f32 %v159_v20, %v160_v24  ;;  %v1055_v30 = vpack.c.bf16 %v79_v22, %v76_v21  ;;  %v167_v33 = vand.u32 4294901760, %v166_v28  ;;  %v174_v34 = vand.u32 4294901760, %v173_v29 }
  0x1b   :  { %841 = vmatpush3.bf16.msra.mxu1 %v1041_v13  ;;  %891 = vmatprep.subr.bf16.mxu0 %v1043_v14  ;;  %v154_v26 = vsub.f32 %v152_v19, %v153_v23  ;;  %v902_v40 = vpack.c.bf16 %v160_v24, %v153_v23  ;;  %v181_v44 = vand.u32 4294901760, %v180_v38  ;;  %v188_v45 = vand.u32 4294901760, %v187_v39  ;;  %p980_p11 = por %p979_p10, %p978_p9 }
  0x1c   :  { %843 = vmatprep.subr.bf16.mxu1 %v1043_v14  ;;  %v162_v32 = vand.u32 4294901760, %v161_v27  ;;  %v1059_v35 = vpack.c.bf16 %v174_v34, %v167_v33  ;;  %v168_v36 = vsub.f32 %v166_v28, %v167_v33  ;;  %v175_v37 = vsub.f32 %v173_v29, %v174_v34 }
  0x1d   :  { %v155_v31 = vand.u32 4294901760, %v154_v26  ;;  %v194_v47 = vsub.f32 %v48_v17, %v76_v21  ;;  %v201_v48 = vsub.f32 %v49_v18, %v79_v22  ;;  %v910_v49 = vpack.c.bf16 %v188_v45, %v181_v44  ;;  %p981_p12 = pnand %p980_p11, %p974_p8 }
  0x1e   :  { %893 = vmatpush3.bf16.msra.mxu0 %v1043_v14  ;;  %v169_v42 = vand.u32 4294901760, %v168_v36  ;;  %v176_v43 = vand.u32 4294901760, %v175_v37  ;;  %v182_v50 = vsub.f32 %v180_v38, %v181_v44  ;;  %v189_v51 = vsub.f32 %v187_v39, %v188_v45 }
  0x1f   :  { %845 = vmatpush3.bf16.msra.mxu1 %v1043_v14  ;;  %895 = vmatprep.subr.bf16.mxu0 %v1051_v25  ;;  %v854_v41 = vpack.c.bf16 %v162_v32, %v155_v31  ;;  %v195_v52 = vand.u32 4294901760, %v194_v47  ;;  %v202_v53 = vand.u32 4294901760, %v201_v48  ;;  %v870_v63 = vpack.c.bf16 %v159_v20, %v152_v19 }
  0x20   :  { %847 = vmatprep.subr.bf16.mxu1 %v1051_v25  ;;  %v858_v46 = vpack.c.bf16 %v176_v43, %v169_v42  ;;  %v183_v54 = vand.u32 4294901760, %v182_v50  ;;  %v190_v55 = vand.u32 4294901760, %v189_v51  ;;  %v874_v0 = vpack.c.bf16 %v173_v29, %v166_v28 }
  0x21   :  { %v914_v56 = vpack.c.bf16 %v202_v53, %v195_v52  ;;  %v196_v57 = vsub.f32 %v194_v47, %v195_v52  ;;  %v203_v58 = vsub.f32 %v201_v48, %v202_v53  ;;  %v878_v1 = vpack.c.bf16 %v187_v39, %v180_v38 }
  0x22   :  { %897 = vmatpush3.bf16.msra.mxu0 %v1051_v25  ;;  %v862_v59 = vpack.c.bf16 %v190_v55, %v183_v54  ;;  %v882_v2 = vpack.c.bf16 %v201_v48, %v194_v47  ;;  %v29_v4 = vand.u32 127, %v28_v3  ;;  %v1003_v6 = vmov 0.0  }
  0x23   :  { %849 = vmatpush3.bf16.msra.mxu1 %v1051_v25  ;;  %899 = vmatprep.subr.bf16.mxu0 %v1055_v30  ;;  %v197_v60 = vand.u32 4294901760, %v196_v57  ;;  %v204_v61 = vand.u32 4294901760, %v203_v58 }
  0x24   :  { %851 = vmatprep.subr.bf16.mxu1 %v1055_v30 }
  0x25   :  { %v866_v62 = vpack.c.bf16 %v204_v61, %v197_v60 }
  0x26   :  { %901 = vmatpush3.bf16.msra.mxu0 %v1055_v30 }
  0x27   :  { %853 = vmatpush3.bf16.msra.mxu1 %v1055_v30  ;;  %903 = vmatprep.subr.bf16.mxu0 %v902_v40 }
  0x28   :  { %855 = vmatprep.subr.bf16.mxu1 %v854_v41 }
  0x94   :  { %v32_v5 = vpop.permute.xlu0 %31 }
  0x95   :  { %vm36_vm1 = vcmp.eq.s32.totalorder %v32_v5, %v29_v4 }
  0x96   :  { %v656_v7 = vsel %vm36_vm1, 1.0, %v1003_v6 }
  0x97   :  { %v52_v8 = vsel %vm50_vm0, %v656_v7, 0 }
  0x98   :  { %v131_v9 = vsub.f32 %v52_v8, %v52_v8  ;;  %v35_v10 = vpop.permute.xlu0 %34 }
  0x99   :  { %vm37_vm2 = vcmp.eq.s32.totalorder %v35_v10, %v29_v4 }
  0x9a   :  { %v657_v11 = vsel %vm37_vm2, 1.0, %v1003_v6  ;;  %v132_v12 = vand.u32 4294901760, %v131_v9 }
  0x9b   :  { %v55_v15 = vsel %vm50_vm0, %v657_v11, 0 }
  0x9c   :  { %v141_v16 = vsub.f32 %v55_v15, %v55_v15  ;;  %797 = vmatprep.mubr.f32.mxu0 %v132_v12  ;;  %v133_v17 = vsub.f32 %v131_v9, %v132_v12 }
  0x9e   :  { %v134_v18 = vand.u32 4294901760, %v133_v17  ;;  %v142_v19 = vand.u32 4294901760, %v141_v16 }
  0xa0   :  { %740 = vmatprep.mubr.f32.mxu1 %v134_v18  ;;  %798 = vmatmul.mubr.f32.vlgmr.msra.gmra.mrb[0].mxu0 %v142_v19  ;;  %v143_v20 = vsub.f32 %v141_v16, %v142_v19 }
  0xa1   :  { %905 = vmatpush3.bf16.msra.mxu0 %v902_v40  ;;  %816 = vmatprep.mubr.msk.f32.mxu0 %vm50_vm0, %v656_v7 }
  0xa2   :  { %907 = vmatprep.subr.bf16.mxu0 %v1059_v35  ;;  %v144_v21 = vand.u32 4294901760, %v143_v20 }
  0xa4   :  { %741 = vmatmul.mubr.f32.vlgmr.msra.gmra.mrb[0].mxu1 %v144_v21 }
  0xa5   :  { %857 = vmatpush3.bf16.msra.mxu1 %v854_v41  ;;  %909 = vmatpush3.bf16.msra.mxu0 %v1059_v35 }
  0xa6   :  { %759 = vmatprep.mubr.msk.f32.mxu1 %vm50_vm0, %v656_v7  ;;  %859 = vmatprep.subr.bf16.mxu1 %v858_v46 }
  0xa7   :  { %911 = vmatprep.subr.bf16.mxu0 %v910_v49 }
  0xa9   :  { %861 = vmatpush3.bf16.msra.mxu1 %v858_v46  ;;  %913 = vmatpush3.bf16.msra.mxu0 %v910_v49 }
  0xaa   :  { %863 = vmatprep.subr.bf16.mxu1 %v862_v59  ;;  %915 = vmatprep.subr.bf16.mxu0 %v914_v56 }
  0xad   :  { %865 = vmatpush3.bf16.msra.mxu1 %v862_v59  ;;  %917 = vmatpush3.bf16.msra.mxu0 %v914_v56 }
  0xae   :  { %867 = vmatprep.subr.bf16.mxu1 %v866_v62  ;;  %919 = vmatprep.subr.bf16.mxu0 %v1041_v13 }
  0xb0   :  { %817 = vmatmul.mubr.msk.f32.vlgmr.msra.gmra.mrb[0].mxu0 %vm50_vm0, %v657_v11 }
  0xb1   :  { %869 = vmatpush3.bf16.msra.mxu1 %v866_v62  ;;  %921 = vmatpush3.bf16.msra.mxu0 %v1041_v13 }
  0xb2   :  { %835 = vmatprep.mubr.msk.f32.mxu0 %vm50_vm0, %v656_v7  ;;  %871 = vmatprep.subr.bf16.mxu1 %v870_v63 }
  0xb3   :  { %923 = vmatprep.subr.bf16.mxu0 %v1043_v14 }
  0xb4   :  { %760 = vmatmul.mubr.msk.f32.vlgmr.msra.gmra.mrb[0].mxu1 %vm50_vm0, %v657_v11 }
  0xb5   :  { %873 = vmatpush3.bf16.msra.mxu1 %v870_v63  ;;  %778 = vmatprep.mubr.f32.mxu1 %v131_v9 }
  0xb6   :  { %925 = vmatpush3.bf16.msra.mxu0 %v1043_v14  ;;  %875 = vmatprep.subr.bf16.mxu1 %v874_v0 }
  0xb7   :  { %927 = vmatprep.subr.bf16.mxu0 %v1051_v25 }
  0xb9   :  { %877 = vmatpush3.bf16.msra.mxu1 %v874_v0 }
  0xba   :  { %929 = vmatpush3.bf16.msra.mxu0 %v1051_v25  ;;  %879 = vmatprep.subr.bf16.mxu1 %v878_v1 }
  0xbb   :  { %931 = vmatprep.subr.bf16.mxu0 %v1055_v30 }
  0xbd   :  { %881 = vmatpush3.bf16.msra.mxu1 %v878_v1 }
  0xbe   :  { %933 = vmatpush3.bf16.msra.mxu0 %v1055_v30  ;;  %883 = vmatprep.subr.bf16.mxu1 %v882_v2 }
  0xc1   :  { %836 = vmatmul.mubr.msk.f32.vlgmr.msra.gmra.mrb[0].mxu0 %vm50_vm0, %v657_v11  ;;  %885 = vmatpush3.bf16.msra.mxu1 %v882_v2 }
  0xc4   :  { %779 = vmatmul.mubr.f32.vlgmr.msra.gmra.mrb[0].mxu1 %v141_v16 }
 0x194   :  { %v837_v13 = vpop.f32.mrb[0].mxu0 }
 0x195   :  { %v627_v22 = vpop.f32.mrb[1].mxu0 }
 0x197   :  { %v780_v14 = vpop.f32.mrb[0].mxu1 }
 0x198   :  { %v934_v23 = vadd.f32 %v837_v13, %v780_v14  ;;  %v351_v24 = vpop.f32.mrb[1].mxu1 }
 0x199   :  { %v935_v26 = vadd.f32 %v627_v22, %v351_v24 }
 0x19a   :  { %638 = vst.msk [vmem:[#allocation5 + $0x8] sm:$0xff] %vm50_vm0, %v934_v23 }
 0x19b   :  { %637 = vst.msk [vmem:[#allocation5] sm:$0xff] %vm50_vm0, %v935_v26 }
 0x19c   :  { %984 = shalt.err (!%p981_p12)
}
 0x19d   :  { %s985_s30 = scalar_lea.hbm %s1104_s2, 256 }
 0x19e   :  { %p986_p13 = scmp.ne.s32.totalorder %s1104_s2, %s985_s30  ;;  %p989_p0 = scmp.lt.u32.totalorder %s985_s30, %s1104_s2 }
 0x1a0   :  { %p991_p1 = pnand %p989_p0, %p986_p13 }
 0x1a2   :  { %994 = shalt.err (!%p991_p1)
}
 0x1a3   :  { %650 = dma.vmem_to_hbm [thread:$0]  %s645_s1, 256, %s1104_s2, [#allocation4], %s1000_s19, %s1000_s19, %s1001_s20  }
 0x1a4   :  { %997 = dma.done.wait [#allocation4], 256  }
 0x1a5   :  { %998 = vsyncadd [#allocation4], 4294967040 }
 0x1a6   :  { %654 = vsyncpa [#allocation3], 1 }
 0x1a7   :  { %655 = vsyncpa [#allocation4], 1 }

</bundles_post_ra>
